<compile_context>
chip_gen: v6e
topology: v6e:2x2x1
jax: 0.10.0
libtpu: 0.0.40
codegen_flags: <defaults>
</compile_context>

<pallas_src>
import jax
import jax.numpy as jnp
from jax.experimental import pallas as pl
from jax.experimental.pallas import tpu as pltpu

_MIB = 1024 * 1024


def _round_up(x, m):
    return ((x + m - 1) // m) * m


def _aligned_divisors(n, align):
    """Divisors of n that are multiples of `align` (ascending)."""
    return [d for d in range(align, n + 1, align) if n % d == 0]


def _choose_tile_k(K, max_tk=2048):
    """Largest aligned divisor of K up to max_tk (prefer 256-multiples for the
    2x256^2 MXU on v6e/v7x, fall back to 128); K itself if no aligned divisor."""
    for align in (256, 128):
        cands = [d for d in _aligned_divisors(K, align) if d <= max_tk]
        if cands:
            return max(cands)
    return K  # no lane-aligned divisor -> single K block (still correct)


def _vmem_info():
    """(vmem_capacity_bytes, is_two_core_chip). Conservative fallback = v7x."""
    try:
        cap = int(pltpu.get_tpu_info().vmem_capacity_bytes)
    except Exception:  # not on TPU / field missing: assume the tightest target
        cap = 64 * _MIB
    # v7x has 64 MiB VMEM per TensorCore and 2 TCs/chip; v5e/v6e have 128 MiB, 1 TC.
    return cap, cap <= 80 * _MIB


def _patch_embed_kernel_fused(x_ref, w_ref, b_ref, o_ref):
    """gk == 1 fast path: single matmul + bias + cast, no accumulator scratch."""
    acc = jnp.dot(x_ref[...], w_ref[...], preferred_element_type=jnp.float32)
    o_ref[...] = (acc + b_ref[...]).astype(o_ref.dtype)


def _patch_embed_kernel_acc(x_ref, w_ref, b_ref, o_ref, acc_ref):
    """K tiled (last, "arbitrary" grid axis) with an f32 VMEM accumulator."""
    k = pl.program_id(2)

    @pl.when(k == 0)
    def _init():
        acc_ref[...] = jnp.zeros_like(acc_ref)

    acc_ref[...] += jnp.dot(x_ref[...], w_ref[...],
                            preferred_element_type=jnp.float32)

    @pl.when(k == pl.num_programs(2) - 1)
    def _finalize():
        o_ref[...] = (acc_ref[...] + b_ref[...]).astype(o_ref.dtype)


def patch_embedding(x, weight, bias, patch_size, *,
                    compute_dtype=jnp.bfloat16, out_dtype=None, tile_m=None):
    """x: [B, C, H, W] (NCHW), weight: [E, C, P, P] (OIHW), bias: [E] -> [B, N, E]."""
    B, C, H, W = x.shape
    E = weight.shape[0]
    P = patch_size
    assert H % P == 0 and W % P == 0
    nh, nw = H // P, W // P
    N = nh * nw
    K = C * P * P
    M = B * N
    out_dtype = compute_dtype if out_dtype is None else out_dtype

    # Lane-dense embedding dim (unmasked vst): pad E up to a multiple of 128.
    E_pad = _round_up(E, 128)

    # --- im2col (cast first so even an unfused producer moves bf16, not f32) ---
    # With allow_input_fusion below, XLA may fuse this producer into the pallas_call
    # input DMA so `patches` is never materialized as a separate HBM pass.
    patches = x.astype(compute_dtype).reshape(B, C, nh, P, nw, P)
    patches = patches.transpose(0, 2, 4, 1, 3, 5).reshape(M, K)

    # Conv2d OIHW weight -> [K, E_pad] with the same (c, p, q) reduction order.
    w_flat = weight.reshape(E, K).T
    if E_pad != E:
        w_flat = jnp.pad(w_flat, ((0, 0), (0, E_pad - E)))
        b_flat = jnp.pad(bias, (0, E_pad - E))
    else:
        b_flat = bias
    w_flat = w_flat.astype(compute_dtype)
    b_flat = b_flat.reshape(1, E_pad).astype(jnp.float32)

    in_b = jnp.dtype(compute_dtype).itemsize
    out_b = jnp.dtype(out_dtype).itemsize

    # --- generation-aware tile sizes ---
    vmem_cap, two_core = _vmem_info()
    budget = int(0.45 * vmem_cap)          # working-set target for tiling
    vmem_ceiling = int(0.78 * vmem_cap)    # headroom for Mosaic internal scratch
    if tile_m is None:
        tile_m = 2048 if vmem_cap >= 96 * _MIB else 1024

    # K tile: aligned divisors of K only (keeps the reduction exact).
    TK = _choose_tile_k(K)
    TN = E_pad
    # Keep the (double-buffered) weight tile within ~1/3 of the budget: shrink TK
    # first, then split the embedding axis.
    while 2 * TK * TN * in_b > budget // 3:
        smaller_k = [d for d in _aligned_divisors(K, 128) if d < TK]
        if smaller_k:
            TK = max(smaller_k)
            continue
        smaller_n = [d for d in _aligned_divisors(E_pad, 128) if d < TN]
        if not smaller_n:
            break
        TN = max(smaller_n)

    gk = pl.cdiv(K, TK)
    gn = pl.cdiv(E_pad, TN)

    TM = min(tile_m, _round_up(M, 8))
    if two_core and gn == 1 and M > 16:
        # Make sure the "parallel" M axis actually splits across both TensorCores.
        TM = min(TM, max(8, _round_up(pl.cdiv(M, 2), 8)))

    def vmem_est(tm, w_bufs, b_bufs):
        est = 2 * tm * TK * in_b            # patches (double-buffered)
        est += w_bufs * TK * TN * in_b      # weight
        est += b_bufs * TN * 4              # bias (f32)
        est += 2 * tm * TN * out_b          # output (double-buffered)
        if gk > 1:
            est += tm * TN * 4              # f32 accumulator scratch
        return est

    # Single-buffer weight/bias when their block index never changes over the grid.
    single_w = (gk == 1 and gn == 1)
    single_b = (gn == 1)
    w_bufs = 1 if single_w else 2
    b_bufs = 1 if single_b else 2

    while vmem_est(TM, w_bufs, b_bufs) > budget and TM > 8:
        TM = TM - 128 if TM > 256 else max(8, (TM // 2) // 8 * 8)

    gm = pl.cdiv(M, TM)

    # Conservative (fully double-buffered) estimate for the limit so the fallback
    # path below also fits.
    vmem_limit = int(min(max(2 * vmem_est(TM, 2, 2), 32 * _MIB), vmem_ceiling))

    cost = pl.CostEstimate(
        flops=2 * M * K * E_pad,
        transcendentals=0,
        bytes_accessed=(M * K * in_b + K * E_pad * in_b
                        + M * E_pad * out_b + E_pad * 4),
    )

    kernel = _patch_embed_kernel_fused if gk == 1 else _patch_embed_kernel_acc
    scratch = [] if gk == 1 else [pltpu.VMEM((TM, TN), jnp.float32)]

    def make_call(use_single_buffer):
        w_kw = ({"pipeline_mode": pl.Buffered(1)}
                if (use_single_buffer and single_w) else {})
        b_kw = ({"pipeline_mode": pl.Buffered(1)}
                if (use_single_buffer and single_b) else {})
        return pl.pallas_call(
            kernel,
            out_shape=jax.ShapeDtypeStruct((M, E_pad), out_dtype),
            grid_spec=pltpu.PrefetchScalarGridSpec(
                num_scalar_prefetch=0,
                grid=(gm, gn, gk),
                in_specs=[
                    pl.BlockSpec((TM, TK), lambda i, j, k: (i, k)),            # patches
                    pl.BlockSpec((TK, TN), lambda i, j, k: (k, j), **w_kw),    # weight
                    pl.BlockSpec((1, TN), lambda i, j, k: (0, j), **b_kw),     # bias
                ],
                out_specs=pl.BlockSpec((TM, TN), lambda i, j, k: (i, j)),
                scratch_shapes=scratch,
            ),
            compiler_params=pltpu.CompilerParams(
                dimension_semantics=("parallel", "parallel", "arbitrary"),
                vmem_limit_bytes=vmem_limit,
                # Let XLA fuse the im2col / weight-reshape producers into the input
                # DMA instead of materializing them as an extra HBM pass.
                allow_input_fusion=[True, True, True],
            ),
            cost_estimate=cost,
        )

    try:
        out = make_call(True)(patches, w_flat, b_flat)
    except Exception:
        # Conservative fallback if single-buffered pipeline_mode is not supported by
        # the installed JAX/Mosaic version; identical numerics, slightly more VMEM.
        out = make_call(False)(patches, w_flat, b_flat)

    if E_pad != E:
        # TODO(synk): for non-128-multiple E this slice is an extra HBM pass; a
        # consumer that accepts the padded [M, E_pad] buffer would avoid it.
        out = out[:, :E]
    # [B*N, E] -> [B, N, E]  (== flatten(2) + transpose(1, 2) of the PyTorch module)
    return out.reshape(B, N, E)


if __name__ == "__main__":
    # Small shapes consistent with the module's forward.
    B, C, H, W = 2, 4, 16, 16
    P = 8            # patch_size
    E = 32           # embed_dim

    key = jax.random.PRNGKey(0)
    kx, kw, kb = jax.random.split(key, 3)
    x = jax.random.normal(kx, (B, C, H, W), dtype=jnp.float32)
    weight = jax.random.normal(kw, (E, C, P, P), dtype=jnp.float32) * 0.02
    bias = jax.random.normal(kb, (E,), dtype=jnp.float32) * 0.02

    # Reference: strided conv (== nn.Conv2d kernel=stride=P), then flatten + transpose.
    ref = jax.lax.conv_general_dilated(
        x, weight, window_strides=(P, P), padding="VALID",
        dimension_numbers=("NCHW", "OIHW", "NCHW"),
    ) + bias[None, :, None, None]
    ref = ref.reshape(B, E, -1).transpose(0, 2, 1)

    # Default path: bf16 MXU inputs, bf16 output (loose tolerance for bf16).
    out = jax.block_until_ready(patch_embedding(x, weight, bias, P))
    assert out.shape == (B, (H // P) * (W // P), E), out.shape
    err = float(jnp.max(jnp.abs(out.astype(jnp.float32) - ref)))
    assert jnp.allclose(out.astype(jnp.float32), ref, atol=2e-2, rtol=2e-2), err

    # f32 compute + f32 output sanity check (tight tolerance).
    out_f32 = jax.block_until_ready(
        patch_embedding(x, weight, bias, P,
                        compute_dtype=jnp.float32, out_dtype=jnp.float32))
    assert jnp.allclose(out_f32, ref, atol=1e-4, rtol=1e-4)

    print("KERNEL_OK")
</pallas_src>

<mosaic_0001>
module attributes {stable_mosaic.version = 11 : i64} {
  func.func @_patch_embed_kernel_fused(%arg0: i32, %arg1: i32, %arg2: i32, %arg3: memref<8x256xbf16, #tpu.memory_space<vmem>>, %arg4: memref<256x128xbf16, #tpu.memory_space<vmem>>, %arg5: memref<1x128xf32, #tpu.memory_space<vmem>>, %arg6: memref<8x128xbf16, #tpu.memory_space<vmem>>) attributes {dimension_semantics = [#tpu.dimension_semantics<parallel>, #tpu.dimension_semantics<parallel>, #tpu.dimension_semantics<arbitrary>], iteration_bounds = array<i64: 1, 1, 1>, scalar_prefetch = 0 : i64, scratch_operands = 0 : i64, tpu.core_type = #tpu.core_type<tc>, window_params = [{transform_indices = @transform_0, window_bounds = array<i64: 8, 256>}, {pipeline_mode = #tpu.pipeline_mode<synchronous>, transform_indices = @transform_1, window_bounds = array<i64: 256, 128>}, {pipeline_mode = #tpu.pipeline_mode<synchronous>, transform_indices = @transform_2, window_bounds = array<i64: 1, 128>}, {transform_indices = @transform_3, window_bounds = array<i64: 8, 128>}]} {
    %c0 = arith.constant 0 : index
    %c0_0 = arith.constant 0 : index
    %0 = vector.load %arg3[%c0, %c0_0] : memref<8x256xbf16, #tpu.memory_space<vmem>>, vector<8x256xbf16>
    %c0_1 = arith.constant 0 : index
    %c0_2 = arith.constant 0 : index
    %1 = vector.load %arg4[%c0_1, %c0_2] : memref<256x128xbf16, #tpu.memory_space<vmem>>, vector<256x128xbf16>
    %cst = arith.constant dense<0.000000e+00> : vector<8x128xf32>
    %2 = tpu.matmul %0, %1, %cst {dimension_numbers = #tpu.dot_dimension_numbers<[1], [0], [0], [1], [0, 0, 1, 1], [], []>} : vector<8x256xbf16>, vector<256x128xbf16>, vector<8x128xf32> -> vector<8x128xf32>
    %c0_3 = arith.constant 0 : index
    %c0_4 = arith.constant 0 : index
    %3 = vector.load %arg5[%c0_3, %c0_4] : memref<1x128xf32, #tpu.memory_space<vmem>>, vector<1x128xf32>
    %4 = vector.broadcast %3 : vector<1x128xf32> to vector<8x128xf32>
    %5 = arith.addf %2, %4 : vector<8x128xf32>
    %6 = arith.truncf %5 : vector<8x128xf32> to vector<8x128xbf16>
    %c0_5 = arith.constant 0 : index
    %c0_6 = arith.constant 0 : index
    %7 = vector.load %arg6[%c0_5, %c0_6] : memref<8x128xbf16, #tpu.memory_space<vmem>>, vector<8x128xbf16>
    tpu.vector_store %arg6[%c0_5, %c0_6], %6 {strides = array<i32>} : memref<8x128xbf16, #tpu.memory_space<vmem>>, vector<8x128xbf16>,
    return
  }
  func.func @transform_0(%arg0: i32, %arg1: i32, %arg2: i32) -> (i32, i32) {
    %c0_i32 = arith.constant 0 : i32
    return %arg0, %arg2 : i32, i32
  }
  func.func @transform_1(%arg0: i32, %arg1: i32, %arg2: i32) -> (i32, i32) {
    %c0_i32 = arith.constant 0 : i32
    return %arg2, %arg1 : i32, i32
  }
  func.func @transform_2(%arg0: i32, %arg1: i32, %arg2: i32) -> (i32, i32) {
    %c0_i32 = arith.constant 0 : i32
    %c0_i32_0 = arith.constant 0 : i32
    return %c0_i32, %arg1 : i32, i32
  }
  func.func @transform_3(%arg0: i32, %arg1: i32, %arg2: i32) -> (i32, i32) {
    %c0_i32 = arith.constant 0 : i32
    return %arg0, %arg1 : i32, i32
  }
}

module attributes {stable_mosaic.version = 11 : i64} {
  func.func @_patch_embed_kernel_fused(%arg0: i32, %arg1: i32, %arg2: i32, %arg3: memref<8x256xbf16, #tpu.memory_space<vmem>>, %arg4: memref<256x128xbf16, #tpu.memory_space<vmem>>, %arg5: memref<1x128xf32, #tpu.memory_space<vmem>>, %arg6: memref<8x128xbf16, #tpu.memory_space<vmem>>) attributes {dimension_semantics = [#tpu.dimension_semantics<parallel>, #tpu.dimension_semantics<parallel>, #tpu.dimension_semantics<arbitrary>], iteration_bounds = array<i64: 1, 1, 1>, scalar_prefetch = 0 : i64, scratch_operands = 0 : i64, tpu.core_type = #tpu.core_type<tc>, window_params = [{transform_indices = @transform_0, window_bounds = array<i64: 8, 256>}, {transform_indices = @transform_1, window_bounds = array<i64: 256, 128>}, {transform_indices = @transform_2, window_bounds = array<i64: 1, 128>}, {transform_indices = @transform_3, window_bounds = array<i64: 8, 128>}]} {
    %c0 = arith.constant 0 : index
    %c0_0 = arith.constant 0 : index
    %0 = vector.load %arg3[%c0, %c0_0] : memref<8x256xbf16, #tpu.memory_space<vmem>>, vector<8x256xbf16>
    %c0_1 = arith.constant 0 : index
    %c0_2 = arith.constant 0 : index
    %1 = vector.load %arg4[%c0_1, %c0_2] : memref<256x128xbf16, #tpu.memory_space<vmem>>, vector<256x128xbf16>
    %cst = arith.constant dense<0.000000e+00> : vector<8x128xf32>
    %2 = tpu.matmul %0, %1, %cst {dimension_numbers = #tpu.dot_dimension_numbers<[1], [0], [0], [1], [0, 0, 1, 1], [], []>} : vector<8x256xbf16>, vector<256x128xbf16>, vector<8x128xf32> -> vector<8x128xf32>
    %c0_3 = arith.constant 0 : index
    %c0_4 = arith.constant 0 : index
    %3 = vector.load %arg5[%c0_3, %c0_4] : memref<1x128xf32, #tpu.memory_space<vmem>>, vector<1x128xf32>
    %4 = vector.broadcast %3 : vector<1x128xf32> to vector<8x128xf32>
    %5 = arith.addf %2, %4 : vector<8x128xf32>
    %6 = arith.truncf %5 : vector<8x128xf32> to vector<8x128xbf16>
    %c0_5 = arith.constant 0 : index
    %c0_6 = arith.constant 0 : index
    %7 = vector.load %arg6[%c0_5, %c0_6] : memref<8x128xbf16, #tpu.memory_space<vmem>>, vector<8x128xbf16>
    tpu.vector_store %arg6[%c0_5, %c0_6], %6 {strides = array<i32>} : memref<8x128xbf16, #tpu.memory_space<vmem>>, vector<8x128xbf16>,
    return
  }
  func.func @transform_0(%arg0: i32, %arg1: i32, %arg2: i32) -> (i32, i32) {
    %c0_i32 = arith.constant 0 : i32
    return %arg0, %arg2 : i32, i32
  }
  func.func @transform_1(%arg0: i32, %arg1: i32, %arg2: i32) -> (i32, i32) {
    %c0_i32 = arith.constant 0 : i32
    return %arg2, %arg1 : i32, i32
  }
  func.func @transform_2(%arg0: i32, %arg1: i32, %arg2: i32) -> (i32, i32) {
    %c0_i32 = arith.constant 0 : i32
    %c0_i32_0 = arith.constant 0 : i32
    return %c0_i32, %arg1 : i32, i32
  }
  func.func @transform_3(%arg0: i32, %arg1: i32, %arg2: i32) -> (i32, i32) {
    %c0_i32 = arith.constant 0 : i32
    return %arg0, %arg1 : i32, i32
  }
}

</mosaic_0001>

<bundles_post_ra>
// kernel: tpu_custom_call.1
= control target key start
LH: loop header
LB: loop body
LE: loop exit
PB: predicated region body
PF: predicated region fallthrough
CT: control target
= control target key end

     0   :  { %8 = vsyncpa [#allocation3], 0  ;;  %s410_s0 = inlined_call_operand.hbm [shape: bf16[8,256], index: 0, kind: input, shape index: {}]   ;;  %s411_s1 = inlined_call_operand.hbm [shape: bf16[256,128], index: 1, kind: input, shape index: {}]   ;;  %s412_s2 = inlined_call_operand.vmem [shape: f32[1,128], index: 2, kind: input, shape index: {}]   ;;  %s413_s3 = inlined_call_operand.hbm [shape: bf16[8,128], index: 3, kind: output, shape index: {}]  }
   0x1   :  { %9 = vsyncpa [#allocation6], 0 }
   0x2   :  { %10 = vsyncpa [#allocation4], 0  ;;  %s373_s12 = smov [#allocation2]   ;;  %s374_s14 = smov [#allocation5]  }
   0x3   :  { %s17_s13 = sshll.u32 %s373_s12, 4  ;;  %s26_s15 = sshll.u32 %s374_s14, 4  ;;  %s18_s13 = int_to_ptr.vmem [resolvable:$true] %s17_s13  ;;  %s27_s15 = int_to_ptr.vmem [resolvable:$true] %s26_s15 }
   0x4   :  { %s315_s16 = scalar_lea.vmem %s18_s13, 128  ;;  %p320_p1 = scmp.lt.s32.totalorder %s18_s13, %s18_s13 }
   0x5   :  { %p316_p0 = scmp.ne.s32.totalorder %s18_s13, %s315_s16  ;;  %p321_p2 = scmp.lt.s32.totalorder %s315_s16, %s315_s16 }
   0x7   :  { %p322_p3 = por %p321_p2, %p320_p1 }
   0x9   :  { %p323_p4 = pnand %p322_p3, %p316_p0 }
   0xb   :  { %326 = shalt.err (!%p323_p4)
}
   0xc   :  { %20 = dma.hbm_to_vmem [thread:$0]  %s410_s0, 128, %s18_s13, [#allocation3]  }
   0xd   :  { %s335_s19 = scalar_lea.vmem %s27_s15, 2048  ;;  %p340_p6 = scmp.lt.s32.totalorder %s27_s15, %s27_s15 }
   0xe   :  { %p336_p5 = scmp.ne.s32.totalorder %s27_s15, %s335_s19  ;;  %p341_p7 = scmp.lt.s32.totalorder %s335_s19, %s335_s19 }
  0x10   :  { %p342_p8 = por %p341_p7, %p340_p6 }
  0x12   :  { %p343_p9 = pnand %p342_p8, %p336_p5 }
  0x14   :  { %346 = shalt.err (!%p343_p9)
}
  0x15   :  { %s375_s20 = smov 64   ;;  %s376_s21 = smov 4  }
  0x16   :  { %32 = dma.hbm_to_vmem [thread:$0]  %s411_s1, 2048, %s27_s15, [#allocation6], %s375_s20, %s375_s20, %s376_s21  }
  0x17   :  { %367 = dma.done.wait [#allocation3], 128  }
  0x18   :  { %368 = vsyncadd [#allocation3], 4294967168 }
  0x19   :  { %369 = dma.done.wait [#allocation6], 2048  }
  0x1a   :  { %370 = vsyncadd [#allocation6], 4294965248  ;;  %v289_v0 = vld [vmem:[#allocation5 + $0x78] sm:$0xff]   ;;  %v291_v2 = vld [vmem:[#allocation5 + $0x70] sm:$0xff]   ;;  %s377_s24 = smov [#allocation7]  }
  0x1b   :  { %v290_v1 = vld [vmem:[#allocation5 + $0x38] sm:$0xff]   ;;  %262 = vmatprep.subr.bf16.mxu0 %v289_v0  ;;  %v292_v3 = vld [vmem:[#allocation5 + $0x30] sm:$0xff]   ;;  %v293_v4 = vld [vmem:[#allocation5 + $0x68] sm:$0xff]   ;;  %s233_s25 = sshll.u32 %s377_s24, 4  ;;  %s234_s25 = int_to_ptr.vmem [resolvable:$true] %s233_s25 }
  0x1c   :  { %263 = vmatpush3.bf16.msra.mxu0 %v290_v1  ;;  %v294_v5 = vld [vmem:[#allocation5 + $0x28] sm:$0xff]   ;;  %v295_v6 = vld [vmem:[#allocation5 + $0x60] sm:$0xff]   ;;  %v297_v8 = vld [vmem:[#allocation5 + $0x58] sm:$0xff]   ;;  %s347_s26 = scalar_lea.vmem %s234_s25, 64  ;;  %p352_p11 = scmp.lt.s32.totalorder %s234_s25, %s234_s25 }
  0x1d   :  { %264 = vmatprep.subr.bf16.mxu0 %v291_v2  ;;  %v296_v7 = vld [vmem:[#allocation5 + $0x20] sm:$0xff]   ;;  %v298_v9 = vld [vmem:[#allocation5 + $0x18] sm:$0xff]   ;;  %v299_v10 = vld [vmem:[#allocation5 + $0x50] sm:$0xff]   ;;  %p348_p10 = scmp.ne.s32.totalorder %s234_s25, %s347_s26  ;;  %p353_p12 = scmp.lt.s32.totalorder %s347_s26, %s347_s26 }
  0x1e   :  { %v42_v11 = vld [vmem:[#allocation2] sm:$0xff]  ;;  %v300_v13 = vld [vmem:[#allocation5 + $0x10] sm:$0xff]   ;;  %v301_v14 = vld [vmem:[#allocation5 + $0x48] sm:$0xff]  }
  0x1f   :  { %v245_v12 = vcombine.high %v42_v11, %v42_v11  ;;  %v302_v15 = vld [vmem:[#allocation5 + $0x8] sm:$0xff]   ;;  %v303_v16 = vld [vmem:[#allocation5 + $0x40] sm:$0xff]   ;;  %v244_v18 = vcombine.low %v42_v11, %v42_v11  ;;  %v243_v20 = vld [vmem:[%s412_s2] ss:$0 sm:$0xff]  ;;  %p354_p13 = por %p353_p12, %p352_p11 }
  0x20   :  { %265 = vmatpush3.bf16.msra.mxu0 %v292_v3  ;;  %v304_v17 = vld [vmem:[#allocation5] sm:$0xff]  }
  0x21   :  { %266 = vmatprep.subr.bf16.mxu0 %v293_v4  ;;  %217 = vmatprep.mubr.bf16.mxu0 %v245_v12  ;;  %p355_p0 = pnand %p354_p13, %p348_p10 }
  0x24   :  { %267 = vmatpush3.bf16.msra.mxu0 %v294_v5 }
  0x25   :  { %268 = vmatprep.subr.bf16.mxu0 %v295_v6 }
  0x28   :  { %269 = vmatpush3.bf16.msra.mxu0 %v296_v7 }
  0x29   :  { %270 = vmatprep.subr.bf16.mxu0 %v297_v8 }
  0x2c   :  { %271 = vmatpush3.bf16.msra.mxu0 %v298_v9 }
  0x2d   :  { %272 = vmatprep.subr.bf16.mxu0 %v299_v10 }
  0x30   :  { %273 = vmatpush3.bf16.msra.mxu0 %v300_v13 }
  0x31   :  { %274 = vmatprep.subr.bf16.mxu0 %v301_v14 }
  0x34   :  { %275 = vmatpush3.bf16.msra.mxu0 %v302_v15 }
  0x35   :  { %276 = vmatprep.subr.bf16.mxu0 %v303_v16 }
  0x38   :  { %277 = vmatpush3.bf16.msra.mxu0 %v304_v17 }
  0x3b   :  { %218 = vmatmul.mubr.bf16.vlgmr.msra.gmra.mxu0 %v244_v18 }
  0xfb   :  { %v278_v19 = vpop.f32.mrf.mxu0 }
  0xfd   :  { %v279_v21 = vpop.f32.mrf.mxu0 }
  0xfe   :  { %v280_v22 = vadd.f32 %v279_v21, %v278_v19 }
  0xff   :  { %v281_v23 = vpop.f32.mrf.mxu0 }
 0x100   :  { %v220_v24 = vadd.f32 %v280_v22, %v243_v20 }
 0x101   :  { %v282_v25 = vpop.f32.mrf.mxu0 }
 0x102   :  { %v225_v26 = vpack.c.bf16 %v220_v24, %v220_v24 }
 0x104   :  { %226 = vst [vmem:[#allocation7] sm:$0xf] %v225_v26 }
 0x105   :  { %358 = shalt.err (!%p355_p0)
}
 0x106   :  { %236 = dma.vmem_to_hbm [thread:$0]  %s234_s25, 64, %s413_s3, [#allocation4]  }
 0x107   :  { %371 = dma.done.wait [#allocation4], 64  }
 0x108   :  { %372 = vsyncadd [#allocation4], 4294967232 }
 0x109   :  { %240 = vsyncpa [#allocation3], 1 }
 0x10a   :  { %241 = vsyncpa [#allocation6], 1 }
 0x10b   :  { %242 = vsyncpa [#allocation4], 1 }

// kernel: tpu_custom_call.1
= control target key start
LH: loop header
LB: loop body
LE: loop exit
PB: predicated region body
PF: predicated region fallthrough
CT: control target
= control target key end

     0   :  { %8 = vsyncpa [#allocation3], 0  ;;  %s410_s0 = inlined_call_operand.hbm [shape: bf16[8,256], index: 0, kind: input, shape index: {}]   ;;  %s411_s1 = inlined_call_operand.hbm [shape: bf16[256,128], index: 1, kind: input, shape index: {}]   ;;  %s412_s2 = inlined_call_operand.vmem [shape: f32[1,128], index: 2, kind: input, shape index: {}]   ;;  %s413_s3 = inlined_call_operand.hbm [shape: bf16[8,128], index: 3, kind: output, shape index: {}]  }
   0x1   :  { %9 = vsyncpa [#allocation6], 0 }
   0x2   :  { %10 = vsyncpa [#allocation4], 0  ;;  %s373_s12 = smov [#allocation2]   ;;  %s374_s14 = smov [#allocation5]  }
   0x3   :  { %s17_s13 = sshll.u32 %s373_s12, 4  ;;  %s26_s15 = sshll.u32 %s374_s14, 4  ;;  %s18_s13 = int_to_ptr.vmem [resolvable:$true] %s17_s13  ;;  %s27_s15 = int_to_ptr.vmem [resolvable:$true] %s26_s15 }
   0x4   :  { %s315_s16 = scalar_lea.vmem %s18_s13, 128  ;;  %p320_p1 = scmp.lt.s32.totalorder %s18_s13, %s18_s13 }
   0x5   :  { %p316_p0 = scmp.ne.s32.totalorder %s18_s13, %s315_s16  ;;  %p321_p2 = scmp.lt.s32.totalorder %s315_s16, %s315_s16 }
   0x7   :  { %p322_p3 = por %p321_p2, %p320_p1 }
   0x9   :  { %p323_p4 = pnand %p322_p3, %p316_p0 }
   0xb   :  { %326 = shalt.err (!%p323_p4)
}
   0xc   :  { %20 = dma.hbm_to_vmem [thread:$0]  %s410_s0, 128, %s18_s13, [#allocation3]  }
   0xd   :  { %s335_s19 = scalar_lea.vmem %s27_s15, 2048  ;;  %p340_p6 = scmp.lt.s32.totalorder %s27_s15, %s27_s15 }
   0xe   :  { %p336_p5 = scmp.ne.s32.totalorder %s27_s15, %s335_s19  ;;  %p341_p7 = scmp.lt.s32.totalorder %s335_s19, %s335_s19 }
  0x10   :  { %p342_p8 = por %p341_p7, %p340_p6 }
  0x12   :  { %p343_p9 = pnand %p342_p8, %p336_p5 }
  0x14   :  { %346 = shalt.err (!%p343_p9)
}
  0x15   :  { %s375_s20 = smov 64   ;;  %s376_s21 = smov 4  }
  0x16   :  { %32 = dma.hbm_to_vmem [thread:$0]  %s411_s1, 2048, %s27_s15, [#allocation6], %s375_s20, %s375_s20, %s376_s21  }
  0x17   :  { %367 = dma.done.wait [#allocation3], 128  }
  0x18   :  { %368 = vsyncadd [#allocation3], 4294967168 }
  0x19   :  { %369 = dma.done.wait [#allocation6], 2048  }
  0x1a   :  { %370 = vsyncadd [#allocation6], 4294965248  ;;  %v289_v0 = vld [vmem:[#allocation5 + $0x78] sm:$0xff]   ;;  %v291_v2 = vld [vmem:[#allocation5 + $0x70] sm:$0xff]   ;;  %s377_s24 = smov [#allocation7]  }
  0x1b   :  { %v290_v1 = vld [vmem:[#allocation5 + $0x38] sm:$0xff]   ;;  %262 = vmatprep.subr.bf16.mxu0 %v289_v0  ;;  %v292_v3 = vld [vmem:[#allocation5 + $0x30] sm:$0xff]   ;;  %v293_v4 = vld [vmem:[#allocation5 + $0x68] sm:$0xff]   ;;  %s233_s25 = sshll.u32 %s377_s24, 4  ;;  %s234_s25 = int_to_ptr.vmem [resolvable:$true] %s233_s25 }
  0x1c   :  { %263 = vmatpush3.bf16.msra.mxu0 %v290_v1  ;;  %v294_v5 = vld [vmem:[#allocation5 + $0x28] sm:$0xff]   ;;  %v295_v6 = vld [vmem:[#allocation5 + $0x60] sm:$0xff]   ;;  %v297_v8 = vld [vmem:[#allocation5 + $0x58] sm:$0xff]   ;;  %s347_s26 = scalar_lea.vmem %s234_s25, 64  ;;  %p352_p11 = scmp.lt.s32.totalorder %s234_s25, %s234_s25 }
  0x1d   :  { %264 = vmatprep.subr.bf16.mxu0 %v291_v2  ;;  %v296_v7 = vld [vmem:[#allocation5 + $0x20] sm:$0xff]   ;;  %v298_v9 = vld [vmem:[#allocation5 + $0x18] sm:$0xff]   ;;  %v299_v10 = vld [vmem:[#allocation5 + $0x50] sm:$0xff]   ;;  %p348_p10 = scmp.ne.s32.totalorder %s234_s25, %s347_s26  ;;  %p353_p12 = scmp.lt.s32.totalorder %s347_s26, %s347_s26 }
  0x1e   :  { %v42_v11 = vld [vmem:[#allocation2] sm:$0xff]  ;;  %v300_v13 = vld [vmem:[#allocation5 + $0x10] sm:$0xff]   ;;  %v301_v14 = vld [vmem:[#allocation5 + $0x48] sm:$0xff]  }
  0x1f   :  { %v245_v12 = vcombine.high %v42_v11, %v42_v11  ;;  %v302_v15 = vld [vmem:[#allocation5 + $0x8] sm:$0xff]   ;;  %v303_v16 = vld [vmem:[#allocation5 + $0x40] sm:$0xff]   ;;  %v244_v18 = vcombine.low %v42_v11, %v42_v11  ;;  %v243_v20 = vld [vmem:[%s412_s2] ss:$0 sm:$0xff]  ;;  %p354_p13 = por %p353_p12, %p352_p11 }
  0x20   :  { %265 = vmatpush3.bf16.msra.mxu0 %v292_v3  ;;  %v304_v17 = vld [vmem:[#allocation5] sm:$0xff]  }
  0x21   :  { %266 = vmatprep.subr.bf16.mxu0 %v293_v4  ;;  %217 = vmatprep.mubr.bf16.mxu0 %v245_v12  ;;  %p355_p0 = pnand %p354_p13, %p348_p10 }
  0x24   :  { %267 = vmatpush3.bf16.msra.mxu0 %v294_v5 }
  0x25   :  { %268 = vmatprep.subr.bf16.mxu0 %v295_v6 }
  0x28   :  { %269 = vmatpush3.bf16.msra.mxu0 %v296_v7 }
  0x29   :  { %270 = vmatprep.subr.bf16.mxu0 %v297_v8 }
  0x2c   :  { %271 = vmatpush3.bf16.msra.mxu0 %v298_v9 }
  0x2d   :  { %272 = vmatprep.subr.bf16.mxu0 %v299_v10 }
  0x30   :  { %273 = vmatpush3.bf16.msra.mxu0 %v300_v13 }
  0x31   :  { %274 = vmatprep.subr.bf16.mxu0 %v301_v14 }
  0x34   :  { %275 = vmatpush3.bf16.msra.mxu0 %v302_v15 }
  0x35   :  { %276 = vmatprep.subr.bf16.mxu0 %v303_v16 }
  0x38   :  { %277 = vmatpush3.bf16.msra.mxu0 %v304_v17 }
  0x3b   :  { %218 = vmatmul.mubr.bf16.vlgmr.msra.gmra.mxu0 %v244_v18 }
  0xfb   :  { %v278_v19 = vpop.f32.mrf.mxu0 }
  0xfd   :  { %v279_v21 = vpop.f32.mrf.mxu0 }
  0xfe   :  { %v280_v22 = vadd.f32 %v279_v21, %v278_v19 }
  0xff   :  { %v281_v23 = vpop.f32.mrf.mxu0 }
 0x100   :  { %v220_v24 = vadd.f32 %v280_v22, %v243_v20 }
 0x101   :  { %v282_v25 = vpop.f32.mrf.mxu0 }
 0x102   :  { %v225_v26 = vpack.c.bf16 %v220_v24, %v220_v24 }
 0x104   :  { %226 = vst [vmem:[#allocation7] sm:$0xf] %v225_v26 }
 0x105   :  { %358 = shalt.err (!%p355_p0)
}
 0x106   :  { %236 = dma.vmem_to_hbm [thread:$0]  %s234_s25, 64, %s413_s3, [#allocation4]  }
 0x107   :  { %371 = dma.done.wait [#allocation4], 64  }
 0x108   :  { %372 = vsyncadd [#allocation4], 4294967232 }
 0x109   :  { %240 = vsyncpa [#allocation3], 1 }
 0x10a   :  { %241 = vsyncpa [#allocation6], 1 }
 0x10b   :  { %242 = vsyncpa [#allocation4], 1 }

</bundles_post_ra>
